<compile_context>
chip_gen: v7x
topology: tpu7x:2x2x1
jax: 0.10.0
libtpu: 0.0.40
codegen_flags: <defaults>
</compile_context>

<pallas_src>
import jax
import jax.numpy as jnp
from jax.experimental import pallas as pl
from jax.experimental.pallas import tpu as pltpu

_MIB = 1024 * 1024


def _round_up(a: int, b: int) -> int:
    return ((a + b - 1) // b) * b


def patch_embed_kernel(p_ref, w_ref, b_ref, o_ref):
    # p_ref: (TN, K)   patch tile (bf16 by default)
    # w_ref: (K, TE)   flattened conv weight tile (transposed)
    # b_ref: (1, TE)   bias tile (f32)
    # o_ref: (TN, TE)
    acc = jnp.dot(p_ref[...], w_ref[...], preferred_element_type=jnp.float32)
    o_ref[...] = (acc + b_ref[...].astype(jnp.float32)).astype(o_ref.dtype)


def patch_embed(x, weight, bias, *, patch_size, flatten=True,
                tile_n=1024, tile_e=256, compute_dtype=jnp.bfloat16,
                out_dtype=None):
    """x: (B, C, H, W); weight: (E, C, P, P); bias: (E,). Returns (B, N, E)."""
    B, C, H, W = x.shape
    E = weight.shape[0]
    P = patch_size
    assert H % P == 0 and W % P == 0, (
        f"Input spatial dims ({H},{W}) must be divisible by patch_size {P}.")
    gh, gw = H // P, W // P
    num_patches = gh * gw
    N = B * num_patches
    K = C * P * P

    compute_dtype = jnp.dtype(compute_dtype if compute_dtype is not None else x.dtype)
    out_dtype = jnp.dtype(out_dtype if out_dtype is not None else x.dtype)
    csz = compute_dtype.itemsize
    osz = out_dtype.itemsize

    # --- glue: patch extraction (im2col for a stride==kernel conv) ---
    # Feature order (c, kh, kw) matches the flattened Conv2d weight.  The
    # reshape/transpose/reshape/astype chain fuses into one XLA copy: read x
    # once, write the bf16 patch matrix once.
    # TODO(synk): fuse this rearrange fully into the kernel (read NCHW blocks
    # and do the (c,kh,kw) permute on the idle XLU slot before the dot) to
    # drop the remaining HBM round trip of the patch matrix.
    patches = (x.reshape(B, C, gh, P, gw, P)
                .transpose(0, 2, 4, 1, 3, 5)
                .reshape(N, K)
                .astype(compute_dtype))
    w2d = weight.reshape(E, K).T.astype(compute_dtype)    # (K, E)
    b2d = bias.reshape(1, E).astype(jnp.float32)          # (1, E)

    # --- embed-dim padding / tiling (byte-based weight residency) ---
    if E >= 128:
        Ep = _round_up(E, 128)     # lane-dense (unmasked) output stores
    else:
        Ep = E                     # tiny E: full-dim block is legal as-is
    if K * Ep * csz <= 6 * _MIB:
        TE = Ep                    # weight stays resident in VMEM
    else:
        TE = min(_round_up(tile_e, 128), Ep)
        Ep = _round_up(Ep, TE)
    if Ep != E:
        w2d = jnp.pad(w2d, ((0, 0), (0, Ep - E)))
        b2d = jnp.pad(b2d, ((0, 0), (0, Ep - E)))

    # --- row tiling: as large as fits a ~24 MiB double-buffered working set ---
    row_mult = 8 * max(1, 4 // csz)          # sublane packing (8 f32 / 16 bf16)

    def working_set(tn):
        return 2 * (tn * K * csz + K * TE * csz + TE * 4 + tn * TE * osz)

    TN = min(tile_n, _round_up(N, row_mult))
    while TN > 256 and working_set(TN) > 24 * _MIB:
        TN = max(256, _round_up(TN // 2, row_mult))

    # Explicit VMEM limit: load-bearing on v5e (16 MiB default scoped limit)
    # once TN is raised; stays well inside v7x's 64 MiB physical VMEM for any
    # configuration that respects the 24 MiB working-set budget above.
    vmem_limit = int(min(max(working_set(TN) + 8 * _MIB, 16 * _MIB), 56 * _MIB))

    grid_n = pl.cdiv(N, TN)        # large N axis outermost -> megacore shards it
    grid_e = Ep // TE              # usually 1 (weight resident in VMEM)

    out = pl.pallas_call(
        patch_embed_kernel,
        out_shape=jax.ShapeDtypeStruct((N, Ep), out_dtype),
        grid_spec=pltpu.PrefetchScalarGridSpec(
            num_scalar_prefetch=0,
            grid=(grid_n, grid_e),
            in_specs=[
                pl.BlockSpec((TN, K), lambda i, j: (i, 0)),
                pl.BlockSpec((K, TE), lambda i, j: (0, j)),
                pl.BlockSpec((1, TE), lambda i, j: (0, j)),
            ],
            out_specs=pl.BlockSpec((TN, TE), lambda i, j: (i, j)),
        ),
        compiler_params=pltpu.CompilerParams(
            dimension_semantics=("parallel", "parallel"),
            vmem_limit_bytes=vmem_limit),
    )(patches, w2d, b2d)

    if Ep != E:
        out = out[:, :E]
    out = out.reshape(B, num_patches, E)
    if not flatten:
        out = out.reshape(B, gh, gw, E).transpose(0, 3, 1, 2)
    return out


if __name__ == "__main__":
    # Small shapes consistent with the module: img_size=16, patch_size=4,
    # in_chans=4, embed_dim=32, batch=2  ->  num_patches = (16/4)^2 = 16.
    B, C, H, W = 2, 4, 16, 16
    P, E = 4, 32

    key = jax.random.PRNGKey(0)
    kx, kw, kb = jax.random.split(key, 3)
    x = jax.random.normal(kx, (B, C, H, W), dtype=jnp.float32)
    weight = jax.random.normal(kw, (E, C, P, P), dtype=jnp.float32) * 0.02
    bias = jax.random.normal(kb, (E,), dtype=jnp.float32) * 0.02

    # reference: conv-as-matmul in plain JAX (same math as nn.Conv2d + flatten
    # + transpose, with norm = Identity)
    gh, gw = H // P, W // P
    ref_patches = x.reshape(B, C, gh, P, gw, P).transpose(0, 2, 4, 1, 3, 5)
    ref_patches = ref_patches.reshape(B, gh * gw, C * P * P)
    ref = jnp.einsum("bnk,ek->bne", ref_patches, weight.reshape(E, -1)) + bias

    # Default path: bf16 operands on the MXU, f32 accumulation.
    out_bf16 = patch_embed(x, weight, bias, patch_size=P)
    out_bf16 = jax.block_until_ready(out_bf16)
    assert out_bf16.shape == (B, gh * gw, E)
    assert jnp.allclose(out_bf16, ref, atol=2e-2, rtol=2e-2)

    # f32-operand path (tight tolerance against the f32 reference).
    out_f32 = patch_embed(x, weight, bias, patch_size=P,
                          compute_dtype=jnp.float32)
    out_f32 = jax.block_until_ready(out_f32)
    assert out_f32.shape == (B, gh * gw, E)
    assert jnp.allclose(out_f32, ref, atol=2e-3, rtol=2e-3)

    print("KERNEL_OK")
</pallas_src>

<mosaic_0001>
module attributes {stable_mosaic.version = 11 : i64} {
  func.func @patch_embed_kernel(%arg0: i32, %arg1: i32, %arg2: memref<32x64xbf16, #tpu.memory_space<vmem>>, %arg3: memref<64x32xbf16, #tpu.memory_space<vmem>>, %arg4: memref<1x32xf32, #tpu.memory_space<vmem>>, %arg5: memref<32x32xf32, #tpu.memory_space<vmem>>) attributes {dimension_semantics = [#tpu.dimension_semantics<parallel>, #tpu.dimension_semantics<parallel>], iteration_bounds = array<i64: 1, 1>, scalar_prefetch = 0 : i64, scratch_operands = 0 : i64, tpu.core_type = #tpu.core_type<tc>, window_params = [{transform_indices = @transform_0, window_bounds = array<i64: 32, 64>}, {transform_indices = @transform_1, window_bounds = array<i64: 64, 32>}, {transform_indices = @transform_2, window_bounds = array<i64: 1, 32>}, {transform_indices = @transform_3, window_bounds = array<i64: 32, 32>}]} {
    %c0 = arith.constant 0 : index
    %c0_0 = arith.constant 0 : index
    %0 = vector.load %arg2[%c0, %c0_0] : memref<32x64xbf16, #tpu.memory_space<vmem>>, vector<32x64xbf16>
    %c0_1 = arith.constant 0 : index
    %c0_2 = arith.constant 0 : index
    %1 = vector.load %arg3[%c0_1, %c0_2] : memref<64x32xbf16, #tpu.memory_space<vmem>>, vector<64x32xbf16>
    %cst = arith.constant dense<0.000000e+00> : vector<32x32xf32>
    %2 = tpu.matmul %0, %1, %cst {dimension_numbers = #tpu.dot_dimension_numbers<[1], [0], [0], [1], [0, 0, 1, 1], [], []>} : vector<32x64xbf16>, vector<64x32xbf16>, vector<32x32xf32> -> vector<32x32xf32>
    %c0_3 = arith.constant 0 : index
    %c0_4 = arith.constant 0 : index
    %3 = vector.load %arg4[%c0_3, %c0_4] : memref<1x32xf32, #tpu.memory_space<vmem>>, vector<1x32xf32>
    %4 = vector.broadcast %3 : vector<1x32xf32> to vector<32x32xf32>
    %5 = arith.addf %2, %4 : vector<32x32xf32>
    %c0_5 = arith.constant 0 : index
    %c0_6 = arith.constant 0 : index
    %6 = vector.load %arg5[%c0_5, %c0_6] : memref<32x32xf32, #tpu.memory_space<vmem>>, vector<32x32xf32>
    tpu.vector_store %arg5[%c0_5, %c0_6], %5 {strides = array<i32>} : memref<32x32xf32, #tpu.memory_space<vmem>>, vector<32x32xf32>,
    return
  }
  func.func @transform_0(%arg0: i32, %arg1: i32) -> (i32, i32) {
    %c0_i32 = arith.constant 0 : i32
    %c0_i32_0 = arith.constant 0 : i32
    return %arg0, %c0_i32 : i32, i32
  }
  func.func @transform_1(%arg0: i32, %arg1: i32) -> (i32, i32) {
    %c0_i32 = arith.constant 0 : i32
    %c0_i32_0 = arith.constant 0 : i32
    return %c0_i32, %arg1 : i32, i32
  }
  func.func @transform_2(%arg0: i32, %arg1: i32) -> (i32, i32) {
    %c0_i32 = arith.constant 0 : i32
    %c0_i32_0 = arith.constant 0 : i32
    return %c0_i32, %arg1 : i32, i32
  }
  func.func @transform_3(%arg0: i32, %arg1: i32) -> (i32, i32) {
    %c0_i32 = arith.constant 0 : i32
    return %arg0, %arg1 : i32, i32
  }
}

</mosaic_0001>

<bundles_post_ra>
// kernel: tpu_custom_call.1
= control target key start
LH: loop header
LB: loop body
LE: loop exit
PB: predicated region body
PF: predicated region fallthrough
CT: control target
= control target key end

     0   :  { %vm69_vm0 = vcmask 523264   ;;  %s262_s0 = inlined_call_operand.vmem [shape: bf16[32,64], index: 0, kind: input, shape index: {}]   ;;  %s263_s1 = inlined_call_operand.vmem [shape: bf16[64,32], index: 1, kind: input, shape index: {}]   ;;  %s264_s2 = inlined_call_operand.vmem [shape: f32[1,32], index: 2, kind: input, shape index: {}]   ;;  %s265_s3 = inlined_call_operand.hbm [shape: f32[32,32], index: 3, kind: output, shape index: {}]  }
   0x1   :  { %v176_v0 = vld [vmem:[%s263_s1] sm:$0xff]   ;;  %v177_v1 = vld [vmem:[%s263_s1 + $0x8] sm:$0xff]   ;;  %v178_v2 = vld [vmem:[%s263_s1 + $0x10] sm:$0xff]  }
   0x2   :  { %161 = vmatprep.subr.bf16.mxu0 %v176_v0  ;;  %v180_v3 = vld [vmem:[%s262_s0] sm:$0xff]  }
   0x3   :  { %162 = vmatpush3.bf16.msra.mxu0 %v176_v0  ;;  %169 = vmatprep.mubr.msk.bf16.mxu0 %vm69_vm0, %v180_v3 }
   0x4   :  { %163 = vmatprep.subr.bf16.mxu0 %v177_v1 }
   0x5   :  { %8 = vsyncpa [#allocation3], 0  ;;  %v179_v4 = vld [vmem:[%s263_s1 + $0x18] sm:$0xff]   ;;  %v181_v5 = vld [vmem:[%s262_s0 + $0x8] sm:$0xff]   ;;  %vm125_vm1 = vcmask 261120   ;;  %s206_s26 = smov [#allocation2]  }
   0x6   :  { %v146_v6 = vld [vmem:[%s264_s2] ss:$0 sm:$0xff]  ;;  %s135_s27 = sshll.u32 %s206_s26, 4  ;;  %s136_s27 = int_to_ptr.vmem [resolvable:$true] %s135_s27 }
   0x7   :  { %164 = vmatpush3.bf16.msra.mxu0 %v177_v1  ;;  %s182_s0 = scalar_lea.vmem %s136_s27, 512  ;;  %p187_p1 = scmp.lt.s32.totalorder %s136_s27, %s136_s27 }
   0x8   :  { %165 = vmatprep.subr.bf16.mxu0 %v178_v2  ;;  %p183_p0 = scmp.ne.s32.totalorder %s136_s27, %s182_s0  ;;  %p188_p2 = scmp.lt.s32.totalorder %s182_s0, %s182_s0 }
   0xa   :  { %p189_p3 = por %p188_p2, %p187_p1 }
   0xb   :  { %166 = vmatpush3.bf16.msra.mxu0 %v178_v2 }
   0xc   :  { %167 = vmatprep.subr.bf16.mxu0 %v179_v4  ;;  %p190_p4 = pnand %p189_p3, %p183_p0 }
   0xf   :  { %168 = vmatpush3.bf16.msra.mxu0 %v179_v4 }
  0x12   :  { %170 = vmatmul.mubr.msk.bf16.vlgmr.msra.gmra.mrb[0].mxu0 %vm69_vm0, %v181_v5 }
  0xe5   :  { %v171_v7 = vpop.f32.mrb[0].mxu0 }
  0xe6   :  { %v119_v8 = vadd.f32 %v171_v7, %v146_v6  ;;  %v110_v9 = vpop.f32.mrb[1].mxu0 }
  0xe7   :  { %v111_v10 = vadd.f32 %v146_v6, %v110_v9  ;;  %v172_v11 = vpop.f32.mrb[2].mxu0 }
  0xe8   :  { %128 = vst.msk [vmem:[#allocation2 + $0x10] sm:$0xff] %vm125_vm1, %v119_v8  ;;  %v122_v12 = vadd.f32 %v172_v11, %v146_v6  ;;  %v113_v13 = vpop.f32.mrb[3].mxu0 }
  0xe9   :  { %126 = vst.msk [vmem:[#allocation2] sm:$0xff] %vm125_vm1, %v111_v10  ;;  %v114_v14 = vadd.f32 %v146_v6, %v113_v13 }
  0xea   :  { %129 = vst.msk [vmem:[#allocation2 + $0x18] sm:$0xff] %vm125_vm1, %v122_v12 }
  0xeb   :  { %127 = vst.msk [vmem:[#allocation2 + $0x8] sm:$0xff] %vm125_vm1, %v114_v14 }
  0xec   :  { %193 = shalt.err (!%p190_p4)
}
  0xed   :  { %s194_s28 = scalar_lea.hbm %s265_s3, 512 }
  0xee   :  { %p195_p5 = scmp.ne.s32.totalorder %s265_s3, %s194_s28  ;;  %p198_p6 = scmp.lt.u32.totalorder %s194_s28, %s265_s3 }
  0xf0   :  { %p200_p7 = pnand %p198_p6, %p195_p5 }
  0xf2   :  { %203 = shalt.err (!%p200_p7)
}
  0xf3   :  { %s207_s6 = smov 128   ;;  %s208_s7 = smov 8  }
  0xf4   :  { %141 = dma.vmem_to_hbm [thread:$0]  %s136_s27, 512, %s265_s3, [#allocation3], %s207_s6, %s207_s6, %s208_s7  }
  0xf5   :  { %204 = dma.done.wait [#allocation3], 512  }
  0xf6   :  { %205 = vsyncadd [#allocation3], 4294966784 }
  0xf7   :  { %145 = vsyncpa [#allocation3], 1 }

</bundles_post_ra>
